<compile_context>
chip_gen: v5e
topology: v5e:2x2
jax: 0.10.0
libtpu: 0.0.40
codegen_flags: <defaults>
</compile_context>

<pallas_src>
import functools

import jax
import jax.numpy as jnp
from jax.experimental import pallas as pl
from jax.experimental.pallas import tpu as pltpu


def _vmem_limit_bytes():
    """Generation-aware scoped-VMEM limit (conservative fallback = v7x)."""
    cap = 64 * 1024 * 1024
    try:
        info = pltpu.get_tpu_info()
        cap = int(getattr(info, "vmem_capacity_bytes", cap)) or cap
    except Exception:
        pass
    limit = min(cap - 16 * 1024 * 1024, 96 * 1024 * 1024)
    return max(limit, 32 * 1024 * 1024)


def _pick_hw_tile(hw, c, itemsize, target_bytes):
    """Largest lane tile (multiple of 128) keeping one (C, thw) block <= target."""
    if c * hw * itemsize <= target_bytes:
        return hw                                   # whole spatial extent fits
    lanes = (target_bytes // (c * itemsize)) // 128 * 128
    lanes = max(128, lanes)
    return min(lanes, hw)


# --------------------------------------------------------------------------
# Fused single-pass kernel: mean + FC/ReLU + FC/sigmoid + scale, per sample.
# --------------------------------------------------------------------------
def _fused_kernel(x_ref, w1_ref, b1_ref, w2_ref, b2_ref, o_ref, *, inv_hw):
    # x_ref/o_ref: (C, HW) in input dtype; w1: (Cmid, C); b1: (Cmid, 1);
    # w2: (C, Cmid); b2: (C, 1).
    mean = jnp.sum(x_ref[...].astype(jnp.float32), axis=-1, keepdims=True) * inv_hw
    h = jnp.dot(w1_ref[...], mean, preferred_element_type=jnp.float32)      # (Cmid,1)
    h = jnp.maximum(h + b1_ref[...], 0.0)                                   # 1x1 conv + ReLU
    s = jnp.dot(w2_ref[...], h, preferred_element_type=jnp.float32)         # (C,1)
    s = jax.nn.sigmoid(s + b2_ref[...])                                     # 1x1 conv + sigmoid
    o_ref[...] = x_ref[...] * s.astype(o_ref.dtype)


# --------------------------------------------------------------------------
# Fallback phase 1: pooled channel sums (two-level reduction, masked last tile)
# --------------------------------------------------------------------------
def _pool_kernel(x_ref, sum_ref, *, hw, thw, n_inner, n_tiles):
    # x_ref: (C, thw); sum_ref: (C, 1) f32 partial sum, resident across inner axis.
    o = pl.program_id(1)          # outer ("parallel") chunk of the HW reduction
    i = pl.program_id(2)          # inner ("arbitrary") reduction step

    @pl.when(i == 0)
    def _():
        sum_ref[...] = jnp.zeros_like(sum_ref)

    def _accum_full():
        sum_ref[...] += jnp.sum(x_ref[...].astype(jnp.float32),
                                axis=-1, keepdims=True)

    if hw % thw == 0:
        _accum_full()                      # no ragged tile -> never mask
    else:
        is_last = (o * n_inner + i) == (n_tiles - 1)
        rem = hw - (n_tiles - 1) * thw     # static

        @pl.when(jnp.logical_not(is_last))
        def _():
            _accum_full()

        @pl.when(is_last)
        def _():
            x = x_ref[...].astype(jnp.float32)
            col = jax.lax.broadcasted_iota(jnp.int32, x.shape, 1)
            x = jnp.where(col < rem, x, 0.0)
            sum_ref[...] += jnp.sum(x, axis=-1, keepdims=True)


# --------------------------------------------------------------------------
# Fallback phase 2: gate FCs folded into the broadcast-multiply.
# --------------------------------------------------------------------------
def _gate_scale_kernel(sum_ref, w1_ref, b1_ref, w2_ref, b2_ref, x_ref, o_ref,
                       *, inv_hw):
    # sum_ref: (n_outer, C, 1) f32 partial channel sums; weights as above;
    # x_ref/o_ref: (C, thw) in input dtype.  The gate is ~100 FLOPs, so it is
    # simply recomputed on every HW tile (its operands are tiny resident blocks).
    mean = jnp.sum(sum_ref[...], axis=0) * inv_hw                            # (C,1)
    h = jnp.dot(w1_ref[...], mean, preferred_element_type=jnp.float32)
    h = jnp.maximum(h + b1_ref[...], 0.0)
    s = jnp.dot(w2_ref[...], h, preferred_element_type=jnp.float32)
    s = jax.nn.sigmoid(s + b2_ref[...])
    o_ref[...] = x_ref[...] * s.astype(o_ref.dtype)


# --------------------------------------------------------------------------
# Wrapper
# --------------------------------------------------------------------------
def squeeze_and_excitation(x_nchw, w1, b1, w2, b2, *,
                           force_fallback=False, fallback_block_bytes=None):
    """x_nchw: (N,C,H,W); w1: (Cmid,C); b1: (Cmid,); w2: (C,Cmid); b2: (C,)."""
    N, C, H, W = x_nchw.shape
    Cmid = w1.shape[0]
    HW = H * W
    dtype = x_nchw.dtype
    itemsize = jnp.dtype(dtype).itemsize

    x_flat = x_nchw.reshape(N, C, HW)
    b1c = b1.reshape(Cmid, 1)
    b2c = b2.reshape(C, 1)
    inv_hw = 1.0 / HW

    vmem_limit = _vmem_limit_bytes()
    compiler_kw = dict(vmem_limit_bytes=vmem_limit)

    slab_bytes = C * HW * itemsize
    w_bytes = 4 * (2 * Cmid * C + Cmid + C)
    # in + out double-buffered, possible f32 upcast temp, weights, headroom.
    fused_ok = (4 * slab_bytes + C * HW * 4 + w_bytes + (4 << 20)) <= vmem_limit

    # ---------------- fused single-pass path ---------------------------------
    if fused_ok and not force_fallback:
        out_flat = pl.pallas_call(
            functools.partial(_fused_kernel, inv_hw=inv_hw),
            out_shape=jax.ShapeDtypeStruct((N, C, HW), dtype),
            grid_spec=pltpu.PrefetchScalarGridSpec(
                num_scalar_prefetch=0,
                grid=(N,),
                in_specs=[
                    pl.BlockSpec((None, C, HW), lambda n: (n, 0, 0)),
                    pl.BlockSpec((Cmid, C), lambda n: (0, 0)),
                    pl.BlockSpec((Cmid, 1), lambda n: (0, 0)),
                    pl.BlockSpec((C, Cmid), lambda n: (0, 0)),
                    pl.BlockSpec((C, 1), lambda n: (0, 0)),
                ],
                out_specs=pl.BlockSpec((None, C, HW), lambda n: (n, 0, 0)),
            ),
            compiler_params=pltpu.CompilerParams(
                dimension_semantics=("parallel",), **compiler_kw),
        )(x_flat, w1, b1c, w2, b2c)
        return out_flat.reshape(N, C, H, W)

    # ---------------- fallback: pool + (gate fused into scale) ---------------
    pool_budget = fallback_block_bytes or (vmem_limit // 3)    # 1 streamed array
    scale_budget = fallback_block_bytes or (vmem_limit // 6)   # 2 streamed arrays

    # phase 1: channel sums over HW
    thw_pool = _pick_hw_tile(HW, C, itemsize, pool_budget)
    n_hw_pool = pl.cdiv(HW, thw_pool)
    # Two-level reduction so both v7x TensorCores are busy when N == 1.
    n_outer = 2 if (N == 1 and n_hw_pool >= 2 and n_hw_pool % 2 == 0) else 1
    n_inner = n_hw_pool // n_outer

    sums = pl.pallas_call(
        functools.partial(_pool_kernel, hw=HW, thw=thw_pool,
                          n_inner=n_inner, n_tiles=n_hw_pool),
        out_shape=jax.ShapeDtypeStruct((N, n_outer, C, 1), jnp.float32),
        grid_spec=pltpu.PrefetchScalarGridSpec(
            num_scalar_prefetch=0,
            grid=(N, n_outer, n_inner),
            in_specs=[pl.BlockSpec(
                (None, C, thw_pool),
                lambda n, o, i, n_inner=n_inner: (n, 0, o * n_inner + i))],
            out_specs=pl.BlockSpec((None, None, C, 1),
                                   lambda n, o, i: (n, o, 0, 0)),
        ),
        compiler_params=pltpu.CompilerParams(
            dimension_semantics=("parallel", "parallel", "arbitrary"),
            **compiler_kw),
    )(x_flat)

    # phase 2: gate (recomputed per tile) + broadcast multiply
    thw = _pick_hw_tile(HW, C, itemsize, scale_budget)
    n_hw = pl.cdiv(HW, thw)

    out_flat = pl.pallas_call(
        functools.partial(_gate_scale_kernel, inv_hw=inv_hw),
        out_shape=jax.ShapeDtypeStruct((N, C, HW), dtype),
        grid_spec=pltpu.PrefetchScalarGridSpec(
            num_scalar_prefetch=0,
            grid=(N, n_hw),
            in_specs=[
                pl.BlockSpec((None, n_outer, C, 1), lambda n, h: (n, 0, 0, 0)),
                pl.BlockSpec((Cmid, C), lambda n, h: (0, 0)),
                pl.BlockSpec((Cmid, 1), lambda n, h: (0, 0)),
                pl.BlockSpec((C, Cmid), lambda n, h: (0, 0)),
                pl.BlockSpec((C, 1), lambda n, h: (0, 0)),
                pl.BlockSpec((None, C, thw), lambda n, h: (n, 0, h)),
            ],
            out_specs=pl.BlockSpec((None, C, thw), lambda n, h: (n, 0, h)),
        ),
        compiler_params=pltpu.CompilerParams(
            dimension_semantics=("parallel", "parallel"), **compiler_kw),
    )(sums, w1, b1c, w2, b2c, x_flat)

    return out_flat.reshape(N, C, H, W)


def _reference(x, w1, b1, w2, b2):
    mean = jnp.mean(x, axis=(2, 3))                         # (N, C)
    h = jnp.maximum(mean @ w1.T + b1, 0.0)                  # (N, Cmid)
    s = jax.nn.sigmoid(h @ w2.T + b2)                       # (N, C)
    return x * s[:, :, None, None]


if __name__ == "__main__":
    # channel must be >= reduction (12) so channel // reduction > 0.
    N, C, H, W = 2, 24, 16, 16
    reduction = 12
    Cmid = C // reduction

    key = jax.random.PRNGKey(0)
    kx, k1, k2, k3, k4 = jax.random.split(key, 5)

    x = jax.random.normal(kx, (N, C, H, W), dtype=jnp.float32)
    # Deterministic synthetic parameters (Conv2d 1x1 == dense over channels).
    w1 = jax.random.normal(k1, (Cmid, C), dtype=jnp.float32) * 0.2
    b1 = jax.random.normal(k2, (Cmid,), dtype=jnp.float32) * 0.1
    w2 = jax.random.normal(k3, (C, Cmid), dtype=jnp.float32) * 0.2
    b2 = jax.random.normal(k4, (C,), dtype=jnp.float32) * 0.1

    se = jax.jit(squeeze_and_excitation,
                 static_argnames=("force_fallback", "fallback_block_bytes"))

    # 1) fused single-pass path (the common case for SE placements).
    y = jax.block_until_ready(se(x, w1, b1, w2, b2))
    y_ref = _reference(x, w1, b1, w2, b2)
    assert y.shape == (N, C, H, W)
    assert jnp.allclose(y, y_ref, atol=1e-5, rtol=1e-5), "fused path mismatch"

    # 2) fallback tiled path (forced, tiny block budget so HW really tiles).
    y_fb = jax.block_until_ready(
        se(x, w1, b1, w2, b2, force_fallback=True, fallback_block_bytes=16384))
    assert jnp.allclose(y_fb, y_ref, atol=1e-5, rtol=1e-5), "fallback mismatch"

    # 3) fallback with N == 1 (exercises the two-level pool reduction).
    x1 = x[:1]
    y1 = jax.block_until_ready(
        se(x1, w1, b1, w2, b2, force_fallback=True, fallback_block_bytes=16384))
    y1_ref = _reference(x1, w1, b1, w2, b2)
    assert jnp.allclose(y1, y1_ref, atol=1e-5, rtol=1e-5), "N=1 fallback mismatch"

    # 4) fallback with a ragged spatial extent (exercises the last-tile mask).
    xr = jax.random.normal(kx, (1, C, 18, 18), dtype=jnp.float32)
    yr = jax.block_until_ready(
        se(xr, w1, b1, w2, b2, force_fallback=True, fallback_block_bytes=16384))
    yr_ref = _reference(xr, w1, b1, w2, b2)
    assert jnp.allclose(yr, yr_ref, atol=1e-5, rtol=1e-5), "ragged fallback mismatch"

    print("KERNEL_OK")
</pallas_src>

<mosaic_0001>
module attributes {stable_mosaic.version = 11 : i64} {
  func.func @_fused_kernel(%arg0: i32, %arg1: memref<1x24x256xf32, #tpu.memory_space<vmem>>, %arg2: memref<2x24xf32, #tpu.memory_space<vmem>>, %arg3: memref<2x1xf32, #tpu.memory_space<vmem>>, %arg4: memref<24x2xf32, #tpu.memory_space<vmem>>, %arg5: memref<24x1xf32, #tpu.memory_space<vmem>>, %arg6: memref<1x24x256xf32, #tpu.memory_space<vmem>>) attributes {dimension_semantics = [#tpu.dimension_semantics<parallel>], iteration_bounds = array<i64: 2>, scalar_prefetch = 0 : i64, scratch_operands = 0 : i64, tpu.core_type = #tpu.core_type<tc>, window_params = [{transform_indices = @transform_0, window_bounds = array<i64: 1, 24, 256>}, {pipeline_mode = #tpu.pipeline_mode<synchronous>, transform_indices = @transform_1, window_bounds = array<i64: 2, 24>}, {pipeline_mode = #tpu.pipeline_mode<synchronous>, transform_indices = @transform_2, window_bounds = array<i64: 2, 1>}, {pipeline_mode = #tpu.pipeline_mode<synchronous>, transform_indices = @transform_3, window_bounds = array<i64: 24, 2>}, {pipeline_mode = #tpu.pipeline_mode<synchronous>, transform_indices = @transform_4, window_bounds = array<i64: 24, 1>}, {transform_indices = @transform_5, window_bounds = array<i64: 1, 24, 256>}]} {
    %c0 = arith.constant 0 : index
    %c0_0 = arith.constant 0 : index
    %c0_1 = arith.constant 0 : index
    %0 = vector.load %arg1[%c0, %c0_0, %c0_1] : memref<1x24x256xf32, #tpu.memory_space<vmem>>, vector<1x24x256xf32>
    %1 = vector.shape_cast %0 : vector<1x24x256xf32> to vector<24x256xf32>
    %cst = arith.constant dense<0.000000e+00> : vector<24xf32>
    %2 = vector.multi_reduction <add>, %1, %cst [1] : vector<24x256xf32> to vector<24xf32>
    %3 = vector.shape_cast %2 : vector<24xf32> to vector<24x1xf32>
    %cst_2 = arith.constant 3.906250e-03 : f32
    %4 = vector.broadcast %cst_2 : f32 to vector<24x1xf32>
    %5 = arith.mulf %3, %4 : vector<24x1xf32>
    %c0_3 = arith.constant 0 : index
    %c0_4 = arith.constant 0 : index
    %6 = vector.load %arg2[%c0_3, %c0_4] : memref<2x24xf32, #tpu.memory_space<vmem>>, vector<2x24xf32>
    %cst_5 = arith.constant dense<0.000000e+00> : vector<2x1xf32>
    %7 = tpu.matmul %6, %5, %cst_5 {dimension_numbers = #tpu.dot_dimension_numbers<[1], [0], [0], [1], [0, 0, 1, 1], [], []>} : vector<2x24xf32>, vector<24x1xf32>, vector<2x1xf32> -> vector<2x1xf32>
    %c0_6 = arith.constant 0 : index
    %c0_7 = arith.constant 0 : index
    %8 = vector.load %arg3[%c0_6, %c0_7] : memref<2x1xf32, #tpu.memory_space<vmem>>, vector<2x1xf32>
    %9 = arith.addf %7, %8 : vector<2x1xf32>
    %cst_8 = arith.constant 0.000000e+00 : f32
    %10 = vector.broadcast %cst_8 : f32 to vector<2x1xf32>
    %11 = arith.maximumf %9, %10 : vector<2x1xf32>
    %c0_9 = arith.constant 0 : index
    %c0_10 = arith.constant 0 : index
    %12 = vector.load %arg4[%c0_9, %c0_10] : memref<24x2xf32, #tpu.memory_space<vmem>>, vector<24x2xf32>
    %cst_11 = arith.constant dense<0.000000e+00> : vector<24x1xf32>
    %13 = tpu.matmul %12, %11, %cst_11 {dimension_numbers = #tpu.dot_dimension_numbers<[1], [0], [0], [1], [0, 0, 1, 1], [], []>} : vector<24x2xf32>, vector<2x1xf32>, vector<24x1xf32> -> vector<24x1xf32>
    %c0_12 = arith.constant 0 : index
    %c0_13 = arith.constant 0 : index
    %14 = vector.load %arg5[%c0_12, %c0_13] : memref<24x1xf32, #tpu.memory_space<vmem>>, vector<24x1xf32>
    %15 = arith.addf %13, %14 : vector<24x1xf32>
    %16 = arith.negf %15 : vector<24x1xf32>
    %17 = math.exp %16 : vector<24x1xf32>
    %cst_14 = arith.constant 1.000000e+00 : f32
    %18 = vector.broadcast %cst_14 : f32 to vector<24x1xf32>
    %19 = arith.addf %18, %17 : vector<24x1xf32>
    %20 = arith.divf %18, %19 : vector<24x1xf32>
    %c0_15 = arith.constant 0 : index
    %c0_16 = arith.constant 0 : index
    %c0_17 = arith.constant 0 : index
    %21 = vector.load %arg1[%c0_15, %c0_16, %c0_17] : memref<1x24x256xf32, #tpu.memory_space<vmem>>, vector<1x24x256xf32>
    %22 = vector.shape_cast %21 : vector<1x24x256xf32> to vector<24x256xf32>
    %23 = vector.broadcast %20 : vector<24x1xf32> to vector<24x256xf32>
    %24 = arith.mulf %22, %23 : vector<24x256xf32>
    %c0_18 = arith.constant 0 : index
    %c0_19 = arith.constant 0 : index
    %c0_20 = arith.constant 0 : index
    %25 = vector.load %arg6[%c0_18, %c0_19, %c0_20] : memref<1x24x256xf32, #tpu.memory_space<vmem>>, vector<1x24x256xf32>
    %26 = vector.shape_cast %25 : vector<1x24x256xf32> to vector<24x256xf32>
    %27 = vector.shape_cast %24 : vector<24x256xf32> to vector<1x24x256xf32>
    tpu.vector_store %arg6[%c0_18, %c0_19, %c0_20], %27 {strides = array<i32>} : memref<1x24x256xf32, #tpu.memory_space<vmem>>, vector<1x24x256xf32>,
    return
  }
  func.func @transform_0(%arg0: i32) -> (i32, i32, i32) {
    %c0_i32 = arith.constant 0 : i32
    %c0_i32_0 = arith.constant 0 : i32
    %c0_i32_1 = arith.constant 0 : i32
    return %arg0, %c0_i32, %c0_i32_0 : i32, i32, i32
  }
  func.func @transform_1(%arg0: i32) -> (i32, i32) {
    %c0_i32 = arith.constant 0 : i32
    %c0_i32_0 = arith.constant 0 : i32
    %c0_i32_1 = arith.constant 0 : i32
    return %c0_i32, %c0_i32_0 : i32, i32
  }
  func.func @transform_2(%arg0: i32) -> (i32, i32) {
    %c0_i32 = arith.constant 0 : i32
    %c0_i32_0 = arith.constant 0 : i32
    %c0_i32_1 = arith.constant 0 : i32
    return %c0_i32, %c0_i32_0 : i32, i32
  }
  func.func @transform_3(%arg0: i32) -> (i32, i32) {
    %c0_i32 = arith.constant 0 : i32
    %c0_i32_0 = arith.constant 0 : i32
    %c0_i32_1 = arith.constant 0 : i32
    return %c0_i32, %c0_i32_0 : i32, i32
  }
  func.func @transform_4(%arg0: i32) -> (i32, i32) {
    %c0_i32 = arith.constant 0 : i32
    %c0_i32_0 = arith.constant 0 : i32
    %c0_i32_1 = arith.constant 0 : i32
    return %c0_i32, %c0_i32_0 : i32, i32
  }
  func.func @transform_5(%arg0: i32) -> (i32, i32, i32) {
    %c0_i32 = arith.constant 0 : i32
    %c0_i32_0 = arith.constant 0 : i32
    %c0_i32_1 = arith.constant 0 : i32
    return %arg0, %c0_i32, %c0_i32_0 : i32, i32, i32
  }
}

</mosaic_0001>

<bundles_post_ra>
// kernel: squeeze_and_excitation.1
= control target key start
LH: loop header
LB: loop body
LE: loop exit
PB: predicated region body
PF: predicated region fallthrough
CT: control target
= control target key end

     0   :  { %s538_s18 = smov 0   ;;  %s610_s0 = inlined_call_operand.vmem [shape: f32[2,24,256], index: 0, kind: input, shape index: {}]   ;;  %s611_s1 = inlined_call_operand.vmem [shape: f32[2,24], index: 1, kind: input, shape index: {}]   ;;  %s612_s2 = inlined_call_operand.vmem [shape: f32[2,1], index: 2, kind: input, shape index: {}]   ;;  %s613_s3 = inlined_call_operand.vmem [shape: f32[24,2], index: 3, kind: input, shape index: {}]   ;;  %s614_s4 = inlined_call_operand.vmem [shape: f32[24,1], index: 4, kind: input, shape index: {}]   ;;  %s615_s5 = inlined_call_operand.vmem [shape: f32[2,24,256], index: 5, kind: output, shape index: {}]  }
   0x1 LB: > { %s455_s19 = sadd.s32 4294967295, %s505_s18   ;;  %p459_p0 = scmp.ge.s32.totalorder %s505_s18, 1  ;;  %s505_s18 = sphi %s538_s18, %s15_s18  }
   0x2   : > { %p187_p1 = scmp.lt.s32.totalorder %s505_s18, 3 }
   0x4   : > { %p188_p2 = pnand %p459_p0, %p187_p1 }
   0x5   : > { %p215_p3 = scmp.lt.s32.totalorder (!%p188_p2), %s455_s19, 1 }
   0x6   : > { %191 = sbr.rel (%p188_p2) target bundleno = 553 (0x229), region = 40 }
   0xb   : > { %s617_s19 = smov (!%p215_p3, %s455_s19), 1  ;;  %v243_v15 = vld [vmem:[%s611_s1] sm:$0x3]  ;;  %vm245_vm0 = vcmask 195584   ;;  %vm286_vm1 = vcmask 1041408   ;;  %vm276_vm2 = vcmask 15360  }
   0xc   : > { %s474_s20 = smul.u32 48, %s617_s19  ;;  %v244_v16 = vld [vmem:[%s612_s2] sm:$0x3]  ;;  %v271_v21 = vld [vmem:[%s613_s3 + $0x8] sm:$0xff]  ;;  %v272_v22 = vld [vmem:[%s613_s3 + $0x10] sm:$0xff]  ;;  %v507_v23 = vmov 0  }
   0xd   : > { %v270_v20 = vld [vmem:[%s613_s3] sm:$0xff]  ;;  %484 = vset.pattern.permute.xlu1 %v507_v23  ;;  %485 = vset.pattern.permute.xlu2 %v507_v23  ;;  %v274_v28 = vld [vmem:[%s614_s4 + $0x8] sm:$0xff]  ;;  %v275_v29 = vld [vmem:[%s614_s4 + $0x10] sm:$0xff] }
   0xe   : > { %s219_s23 = scalar_lea.vmem %s610_s0, %s474_s20  ;;  %486 = vset.pattern.permute.xlu0 %v507_v23  ;;  %v273_v24 = vld [vmem:[%s614_s4] sm:$0xff]  ;;  %s224_s17 = scalar_lea.vmem %s615_s5, %s474_s20 }
   0xf   : > { %v554_v0 = vld [vmem:[%s219_s23 + $0x20] sm:$0xff]  ;;  %v556_v1 = vld [vmem:[%s219_s23 + $0x28] sm:$0xff]  ;;  %v566_v6 = vld [vmem:[%s219_s23 + $0x10] sm:$0xff] }
  0x10   : > { %v237_v2 = vadd.f32 %v556_v1, %v554_v0  ;;  %v560_v3 = vld [vmem:[%s219_s23] sm:$0xff]  ;;  %v562_v4 = vld [vmem:[%s219_s23 + $0x8] sm:$0xff]  ;;  %v568_v7 = vld [vmem:[%s219_s23 + $0x18] sm:$0xff] }
  0x11   : > { %v231_v5 = vadd.f32 %v562_v4, %v560_v3  ;;  %v234_v8 = vadd.f32 %v568_v7, %v566_v6 }
  0x12   : > { %238 = vadd.xlane.f32.xlu0 %v237_v2 }
  0x13   : > { %232 = vadd.xlane.f32.xlu1 %v231_v5 }
  0x1a   : > { %235 = vadd.xlane.f32.xlu0 %v234_v8 }
  0x85   : > { %v239_v9 = vpop.xlane.xlu0 %238 }
  0x86   : > { %v242_v10 = vmul.f32 0.00390625, %v239_v9  ;;  %v233_v11 = vpop.xlane.xlu1 %232 }
  0x87   : > { %v240_v14 = vmul.f32 0.00390625, %v233_v11 }
  0x88   : > { %262 = vmatpush.msra.mxu0 %v242_v10 }
  0x8d   : > { %v236_v12 = vpop.xlane.xlu0 %235 }
  0x8e   : > { %v241_v13 = vmul.f32 0.00390625, %v236_v12 }
  0x90   : > { %263 = vmatpush.msra.mxu0 %v241_v13 }
  0x92   : > { %264 = vmatpush.msra.mxu0 %v240_v14 }
  0x93   : > { %462 = vmatmul.msk.f32.vlgmr.msra.gmra.mxu0 %vm245_vm0, %v243_v15 }
 0x110   : > { %v266_v17 = vpop.f32.mrf.mxu0 }
 0x111   : > { %v267_v18 = vadd.f32 %v266_v17, %v244_v16 }
 0x113   : > { %v269_v19 = vmax.f32 %v267_v18, 0.0 }
 0x115   : > { %463 = vmatpush.msk.msra.mxu1 %vm286_vm1, %v269_v19  ;;  %472 = vmatpush.msk.msra.mxu2 %vm286_vm1, %v269_v19 }
 0x116   : > { %473 = vmatpush.msk.msra.mxu3 %vm286_vm1, %v269_v19  ;;  %464 = vmatmul.msk.f32.vlgmr.msra.gmra.mxu1 %vm276_vm2, %v270_v20 }
 0x117   : > { %465 = vmatmul.msk.f32.vlgmr.msra.gmra.mxu2 %vm276_vm2, %v271_v21  ;;  %466 = vmatmul.msk.f32.vlgmr.msra.gmra.mxu3 %vm276_vm2, %v272_v22 }
 0x193   : > { %v307_v25 = vpop.f32.mrf.mxu1 }
 0x194   : > { %v308_v26 = vadd.f32 %v307_v25, %v273_v24 }
 0x196   : > { %v467_v27 = vmul.f32 -1.442695, %v308_v26 }
 0x198   : > { %487 = vpow2.f32 %v467_v27 }
 0x19a   : > { %v310_v30 = vpop.f32.mrf.mxu2  ;;  %v313_v31 = vpop.f32.mrf.mxu3 }
 0x19b   : > { %v311_v32 = vadd.f32 %v310_v30, %v274_v28  ;;  %v314_v33 = vadd.f32 %v313_v31, %v275_v29 }
 0x19d   : > { %v468_v34 = vmul.f32 -1.442695, %v311_v32  ;;  %v469_v35 = vmul.f32 -1.442695, %v314_v33 }
 0x19e   : > { %v488_v36 = vpop.eup %487 }
 0x19f   : > { %v325_v37 = vadd.f32 1.0, %v488_v36  ;;  %489 = vpow2.f32 %v468_v34 }
 0x1a0   : > { %491 = vpow2.f32 %v469_v35 }
 0x1a1   : > { %493 = vrcp.f32 %v325_v37  ;;  %v339_v45 = vand.u32 2147483648, %v325_v37  ;;  %v337_v47 = vand.u32 2147483647, %v325_v37  ;;  %vm333_vm4 = vweird.f32 %v325_v37 }
 0x1a3   : > { %v340_v51 = vor.u32 1.1754944e-38, %v339_v45  ;;  %vm338_vm6 = vcmp.eq.f32.partialorder %v337_v47, 8.507059e+37 }
 0x1a5   : > { %v490_v38 = vpop.eup %489 }
 0x1a6   : > { %v492_v39 = vpop.eup %491  ;;  %v326_v40 = vadd.f32 1.0, %v490_v38 }
 0x1a7   : > { %v494_v41 = vpop.eup %493  ;;  %v327_v42 = vadd.f32 1.0, %v492_v39 }
 0x1a8   : > { %495 = vrcp.f32 %v326_v40  ;;  %v329_v43 = vmul.f32 %v494_v41, %v325_v37  ;;  %vm334_vm3 = vweird.f32 %v494_v41  ;;  %v354_v57 = vand.u32 2147483648, %v326_v40 }
 0x1a9   : > { %497 = vrcp.f32 %v327_v42  ;;  %vm335_vm5 = vmor %vm333_vm4, %vm334_vm3  ;;  %vm348_vm7 = vweird.f32 %v326_v40  ;;  %v352_v60 = vand.u32 2147483647, %v326_v40  ;;  %vm363_vm11 = vweird.f32 %v327_v42 }
 0x1aa   : > { %v330_v44 = vsub.f32 1.0, %v329_v43  ;;  %v355_v63 = vor.u32 1.1754944e-38, %v354_v57  ;;  %v369_v8 = vand.u32 2147483648, %v327_v42  ;;  %v367_v10 = vand.u32 2147483647, %v327_v42 }
 0x1ab   : > { %vm353_vm10 = vcmp.eq.f32.partialorder %v352_v60, 8.507059e+37 }
 0x1ac   : > { %v331_v46 = vmul.f32 %v494_v41, %v330_v44  ;;  %v370_v11 = vor.u32 1.1754944e-38, %v369_v8  ;;  %vm368_vm14 = vcmp.eq.f32.partialorder %v367_v10, 8.507059e+37 }
 0x1ae   : > { %v496_v48 = vpop.eup %495  ;;  %v332_v49 = vadd.f32 %v494_v41, %v331_v46 }
 0x1af   : > { %v498_v50 = vpop.eup %497  ;;  %v344_v52 = vmul.f32 %v496_v48, %v326_v40  ;;  %vm349_vm8 = vweird.f32 %v496_v48 }
 0x1b0   : > { %v336_v53 = vsel %vm335_vm5, %v494_v41, %v332_v49  ;;  %v359_v54 = vmul.f32 %v498_v50, %v327_v42  ;;  %vm350_vm9 = vmor %vm348_vm7, %vm349_vm8  ;;  %vm364_vm12 = vweird.f32 %v498_v50 }
 0x1b1   : > { %v341_v55 = vsel %vm338_vm6, %v340_v51, %v336_v53  ;;  %v345_v56 = vsub.f32 1.0, %v344_v52  ;;  %vm365_vm13 = vmor %vm363_vm11, %vm364_vm12 }
 0x1b2   : > { %375 = vperm.xlu1 %484, %v341_v55   ;;  %v360_v58 = vsub.f32 1.0, %v359_v54 }
 0x1b3   : > { %v346_v59 = vmul.f32 %v496_v48, %v345_v56 }
 0x1b4   : > { %v361_v62 = vmul.f32 %v498_v50, %v360_v58 }
 0x1b5   : > { %v347_v61 = vadd.f32 %v496_v48, %v346_v59 }
 0x1b6   : > { %v362_v9 = vadd.f32 %v498_v50, %v361_v62 }
 0x1b7   : > { %v351_v2 = vsel %vm350_vm9, %v496_v48, %v347_v61 }
 0x1b8   : > { %v356_v5 = vsel %vm353_vm10, %v355_v63, %v351_v2  ;;  %v366_v12 = vsel %vm365_vm13, %v498_v50, %v362_v9 }
 0x1b9   : > { %380 = vperm.xlu2 %485, %v356_v5   ;;  %v371_v13 = vsel %vm368_vm14, %v370_v11, %v366_v12 }
 0x1c1   : > { %385 = vperm.xlu2 %485, %v371_v13  }
 0x213   : > { %v381_v14 = vpop.permute.xlu2 %380 }
 0x214   : > { %v390_v15 = vmul.f32 %v381_v14, %v566_v6  ;;  %v391_v16 = vmul.f32 %v381_v14, %v568_v7 }
 0x216   : > { %396 = vst [vmem:[%s224_s17 + $0x10] sm:$0xff] %v390_v15 }
 0x217   : > { %397 = vst [vmem:[%s224_s17 + $0x18] sm:$0xff] %v391_v16 }
 0x21b   : > { %v386_v17 = vpop.permute.xlu2 %385 }
 0x21c   : > { %v392_v18 = vmul.f32 %v386_v17, %v554_v0  ;;  %v393_v19 = vmul.f32 %v386_v17, %v556_v1 }
 0x21e   : > { %398 = vst [vmem:[%s224_s17 + $0x20] sm:$0xff] %v392_v18 }
 0x21f   : > { %399 = vst [vmem:[%s224_s17 + $0x28] sm:$0xff] %v393_v19 }
 0x224   : > { %v376_v20 = vpop.permute.xlu1 %375 }
 0x225   : > { %v388_v21 = vmul.f32 %v376_v20, %v560_v3  ;;  %v389_v22 = vmul.f32 %v376_v20, %v562_v4 }
 0x227   : > { %394 = vst [vmem:[%s224_s17] sm:$0xff] %v388_v21 }
 0x228   : > { %395 = vst [vmem:[%s224_s17 + $0x8] sm:$0xff] %v389_v22 }
 0x229 PF: > { %s15_s18 = sadd.s32 1, %s505_s18  }
 0x22a   : > { %p12_p4 = scmp.ge.s32.totalorder %s15_s18, 4  }
 0x22c   :  { %14 = sbr.rel (!%p12_p4) target bundleno = 1 (0x1), region = 70 }

</bundles_post_ra>
